<compile_context>
chip_gen: v5e
topology: v5e:2x2
jax: 0.10.0
libtpu: 0.0.40
codegen_flags: <defaults>
</compile_context>

<pallas_src>
import math

import jax
import jax.numpy as jnp
from jax.experimental import pallas as pl
from jax.experimental.pallas import tpu as pltpu


def _build_pe(d_model: int, max_len: int) -> jnp.ndarray:
    """Sinusoidal positional-encoding table, shape (max_len, 1, d_model)."""
    position = jnp.arange(max_len, dtype=jnp.float32)[:, None]            # (max_len, 1)
    div_term = jnp.exp(
        jnp.arange(0, d_model, 2, dtype=jnp.float32) * (-math.log(10000.0) / d_model)
    )                                                                     # (d_model//2,)
    angles = position * div_term                                          # (max_len, d_model//2)
    pe = jnp.zeros((max_len, d_model), dtype=jnp.float32)
    pe = pe.at[:, 0::2].set(jnp.sin(angles))
    pe = pe.at[:, 1::2].set(jnp.cos(angles))
    return pe[:, None, :]                                                 # (max_len, 1, d_model)


def _add_pe_kernel(x_ref, pe_ref, o_ref):
    # x_ref/o_ref: (ts, tl) lane-dense tile of the (S, B*D) view of x.
    # pe_ref     : (ts, D)  tile of the PE table. tl is always a multiple of D,
    #              so broadcasting over the folded batch is a static lane
    #              concat of reps = tl // D copies (one-time per block, hidden
    #              under the block DMA).
    reps = x_ref.shape[-1] // pe_ref.shape[-1]
    pe = pe_ref[...]
    if reps > 1:
        pe = jnp.concatenate([pe] * reps, axis=-1)
    o_ref[...] = (x_ref[...] + pe).astype(o_ref.dtype)


def _choose_tiles(S: int, W: int, D: int, itemsize: int,
                  target_block_bytes: int = 4 << 20):
    """Pick (ts, tl) tiles for the (S, W = B*D) view.

    Invariants:
      * tl % D == 0 (exact PE broadcast inside a block) and tl is either W
        (full rows) or a multiple of 128 (lane-dense, unmasked stores).
      * ts is either S (full dim, always legal) or a multiple of the
        dtype-aware sublane count.
    """
    sublane = max(8, 32 // max(itemsize, 1))          # 8 f32, 16 bf16, 32 int8/fp8
    rmin = min(S, sublane)                            # minimum legal block row count

    # ---- lane tile ----
    if rmin * W * itemsize <= target_block_bytes:
        tl = W                                        # full rows fit the target block
    else:
        # smallest lane unit that is a multiple of both D and 128
        unit = (D * 128) // math.gcd(D, 128)
        if W % unit == 0:
            tl = unit
            while W % (tl * 2) == 0 and tl * 2 * rmin * itemsize <= target_block_bytes:
                tl *= 2
        else:
            # TODO(synk): awkward B*D not divisible by lcm(D,128); fall back to
            # full rows (correct, may exceed the target block size).
            tl = W

    # ---- seq tile ----
    ts = max(1, target_block_bytes // (tl * itemsize))
    if S <= sublane:
        ts = S                                        # full-extent block, always legal
    else:
        ts = min(ts, S)
        ts = max(sublane, (ts // sublane) * sublane)  # round to sublane multiple

    # Keep the pipeline footprint (2 x + 2 out double-buffered blocks) well
    # under v7x's 64 MiB physical VMEM.
    while 4 * ts * tl * itemsize > (40 << 20) and ts > sublane:
        ts = max(sublane, ((ts // 2) // sublane) * sublane)

    return ts, tl


def positional_encoding(x: jnp.ndarray, pe: jnp.ndarray) -> jnp.ndarray:
    """x: (S, B, D); pe: (max_len, 1, D) or (max_len, D). Returns x + pe[:S]."""
    S, B, D = x.shape
    if pe.ndim == 3:
        pe = pe.reshape(pe.shape[0], pe.shape[-1])    # drop singleton batch dim
    max_len = pe.shape[0]
    assert S <= max_len, f"seq_len {S} exceeds PE table length {max_len}"

    # Add in x's dtype (bf16 stays bf16 end-to-end on v6e/v7x).
    # NOTE: for bf16 x + f32 PE torch would promote to f32; here output keeps x.dtype.
    pe = pe[:S].astype(x.dtype)                       # tiny (S, D) slab

    W = B * D
    x2 = x.reshape(S, W)                              # lane-dense view (free, row-major)
    itemsize = jnp.dtype(x.dtype).itemsize
    ts, tl = _choose_tiles(S, W, D, itemsize)

    # Lane (folded-batch) axis is the innermost grid axis so the PE block index
    # is constant across consecutive steps and its DMA is elided.
    grid = (pl.cdiv(S, ts), pl.cdiv(W, tl))

    blk_bytes = ts * tl * itemsize
    pe_bytes = ts * D * itemsize
    vmem_needed = 4 * blk_bytes + 2 * pe_bytes        # 2x x + 2x out + 2x pe buffers
    vmem_limit = int(max(32 << 20, vmem_needed + (4 << 20)))

    out2 = pl.pallas_call(
        _add_pe_kernel,
        out_shape=jax.ShapeDtypeStruct((S, W), x.dtype),
        grid_spec=pltpu.PrefetchScalarGridSpec(
            num_scalar_prefetch=0,
            grid=grid,
            in_specs=[
                pl.BlockSpec((ts, tl), lambda i, j: (i, j)),
                pl.BlockSpec((ts, D), lambda i, j: (i, 0)),
            ],
            out_specs=pl.BlockSpec((ts, tl), lambda i, j: (i, j)),
        ),
        compiler_params=pltpu.CompilerParams(
            dimension_semantics=("parallel", "parallel"),
            vmem_limit_bytes=vmem_limit,
        ),
    )(x2, pe)
    return out2.reshape(S, B, D)


if __name__ == "__main__":
    d_model = 32
    max_len = 64
    seq_len = 8
    batch = 2

    key = jax.random.PRNGKey(0)
    x = jax.random.normal(key, (seq_len, batch, d_model), dtype=jnp.float32)

    pe = _build_pe(d_model, max_len)                  # (max_len, 1, d_model)

    out = jax.block_until_ready(positional_encoding(x, pe))

    # reference check (plain JAX broadcast add, identical to the torch forward)
    ref = x + pe[:seq_len]
    assert out.shape == (seq_len, batch, d_model)
    assert jnp.allclose(out, ref, atol=1e-6), "mismatch vs reference"

    print("KERNEL_OK")
</pallas_src>

<mosaic_0001>
module attributes {stable_mosaic.version = 11 : i64} {
  func.func @_add_pe_kernel(%arg0: i32, %arg1: i32, %arg2: memref<8x64xf32, #tpu.memory_space<vmem>>, %arg3: memref<8x32xf32, #tpu.memory_space<vmem>>, %arg4: memref<8x64xf32, #tpu.memory_space<vmem>>) attributes {dimension_semantics = [#tpu.dimension_semantics<parallel>, #tpu.dimension_semantics<parallel>], iteration_bounds = array<i64: 1, 1>, scalar_prefetch = 0 : i64, scratch_operands = 0 : i64, tpu.core_type = #tpu.core_type<tc>, window_params = [{transform_indices = @transform_0, window_bounds = array<i64: 8, 64>}, {transform_indices = @transform_1, window_bounds = array<i64: 8, 32>}, {transform_indices = @transform_2, window_bounds = array<i64: 8, 64>}]} {
    %c0 = arith.constant 0 : index
    %c0_0 = arith.constant 0 : index
    %0 = vector.load %arg3[%c0, %c0_0] : memref<8x32xf32, #tpu.memory_space<vmem>>, vector<8x32xf32>
    %1 = tpu.concatenate %0, %0 in 1 : vector<8x32xf32>, vector<8x32xf32> -> vector<8x64xf32>
    %c0_1 = arith.constant 0 : index
    %c0_2 = arith.constant 0 : index
    %2 = vector.load %arg2[%c0_1, %c0_2] : memref<8x64xf32, #tpu.memory_space<vmem>>, vector<8x64xf32>
    %3 = arith.addf %2, %1 : vector<8x64xf32>
    %c0_3 = arith.constant 0 : index
    %c0_4 = arith.constant 0 : index
    %4 = vector.load %arg4[%c0_3, %c0_4] : memref<8x64xf32, #tpu.memory_space<vmem>>, vector<8x64xf32>
    tpu.vector_store %arg4[%c0_3, %c0_4], %3 {strides = array<i32>} : memref<8x64xf32, #tpu.memory_space<vmem>>, vector<8x64xf32>,
    return
  }
  func.func @transform_0(%arg0: i32, %arg1: i32) -> (i32, i32) {
    %c0_i32 = arith.constant 0 : i32
    return %arg0, %arg1 : i32, i32
  }
  func.func @transform_1(%arg0: i32, %arg1: i32) -> (i32, i32) {
    %c0_i32 = arith.constant 0 : i32
    %c0_i32_0 = arith.constant 0 : i32
    return %arg0, %c0_i32 : i32, i32
  }
  func.func @transform_2(%arg0: i32, %arg1: i32) -> (i32, i32) {
    %c0_i32 = arith.constant 0 : i32
    return %arg0, %arg1 : i32, i32
  }
}

</mosaic_0001>

<bundles_post_ra>
// kernel: tpu_custom_call.1
= control target key start
LH: loop header
LB: loop body
LE: loop exit
PB: predicated region body
PF: predicated region fallthrough
CT: control target
= control target key end

     0   :  { %7 = vsyncpa [#allocation3], 0  ;;  %s179_s0 = inlined_call_operand.hbm [shape: f32[8,64], index: 0, kind: input, shape index: {}]   ;;  %s180_s1 = inlined_call_operand.hbm [shape: f32[8,32], index: 1, kind: input, shape index: {}]   ;;  %s181_s2 = inlined_call_operand.hbm [shape: f32[8,64], index: 2, kind: output, shape index: {}]  }
   0x1   :  { %8 = vsyncpa [#allocation6], 0 }
   0x2   :  { %9 = vsyncpa [#allocation4], 0  ;;  %s15_s11 = sshll.u32 %s179_s0, 4  ;;  %s151_s12 = smov [#allocation2]   ;;  %s16_s11 = int_to_ptr.hbm [resolvable:$true] %s15_s11 }
   0x3   :  { %s17_s13 = sshll.u32 %s151_s12, 4  ;;  %s26_s16 = sshll.u32 %s180_s1, 4  ;;  %s18_s13 = int_to_ptr.vmem [resolvable:$true] %s17_s13  ;;  %s27_s16 = int_to_ptr.hbm [resolvable:$true] %s26_s16 }
   0x4   :  { %20 = dma.hbm_to_vmem [thread:$0]  %s16_s11, 128, %s18_s13, [#allocation3]  }
   0x5   :  { %s152_s17 = smov [#allocation5]  }
   0x6   :  { %s28_s18 = sshll.u32 %s152_s17, 4  ;;  %s29_s18 = int_to_ptr.vmem [resolvable:$true] %s28_s18 }
   0x7   :  { %31 = dma.hbm_to_vmem [thread:$0]  %s27_s16, 128, %s29_s18, [#allocation6]  }
   0x8   :  { %145 = dma.done.wait [#allocation3], 128  }
   0x9   :  { %146 = vsyncadd [#allocation3], 4294967168 }
   0xa   :  { %147 = dma.done.wait [#allocation6], 128  }
   0xb   :  { %148 = vsyncadd [#allocation6], 4294967168  ;;  %v40_v0 = vld [vmem:[#allocation5] sm:$0xff]  ;;  %s153_s0 = smov 32   ;;  %vm45_vm0 = vcmask 261120   ;;  %v47_v1 = vld [vmem:[#allocation2] sm:$0xff] }
   0xc   :  { %42 = vrot.lane.b32.xlu0 %v40_v0, %s153_s0  ;;  %s154_s19 = smov [#allocation7]   ;;  %s58_s1 = sshll.u32 %s181_s2, 4  ;;  %vm49_vm1 = vcmask 523264   ;;  %s59_s1 = int_to_ptr.hbm [resolvable:$true] %s58_s1 }
   0xd   :  { %s56_s20 = sshll.u32 %s154_s19, 4  ;;  %s57_s20 = int_to_ptr.vmem [resolvable:$true] %s56_s20 }
  0x7e   :  { %v43_v2 = vpop.permute.xlu0 %42 }
  0x7f   :  { %v46_v3 = vsel %vm45_vm0, %v40_v0, %v43_v2 }
  0x80   :  { %v48_v4 = vadd.f32 %v47_v1, %v46_v3 }
  0x82   :  { %50 = vst.msk [vmem:[#allocation7] sm:$0xff] %vm49_vm1, %v48_v4 }
  0x83   :  { %61 = dma.vmem_to_hbm [thread:$0]  %s57_s20, 128, %s59_s1, [#allocation4]  }
  0x84   :  { %149 = dma.done.wait [#allocation4], 128  }
  0x85   :  { %150 = vsyncadd [#allocation4], 4294967168 }
  0x86   :  { %66 = vsyncpa [#allocation3], 1 }
  0x87   :  { %67 = vsyncpa [#allocation6], 1 }
  0x88   :  { %68 = vsyncpa [#allocation4], 1 }

</bundles_post_ra>
